<compile_context>
chip_gen: v6e
topology: v6e:2x2x1
jax: 0.10.0
libtpu: 0.0.40
codegen_flags: <defaults>
</compile_context>

<pallas_src>
import math

import jax
import jax.numpy as jnp
from jax.experimental import pallas as pl
from jax.experimental.pallas import tpu as pltpu


def _round_up(x, m):
    return ((x + m - 1) // m) * m


# --------------------------------------------------------------------------
# Kernels
# --------------------------------------------------------------------------
def _gcn_layer_kernel(a_ref, b_ref, w_ref, bias_ref, out_ref, acc_ref):
    """out = relu((A @ B) @ W + bias), accumulated over the k grid axis."""
    k = pl.program_id(1)

    @pl.when(k == 0)
    def _():
        acc_ref[...] = jnp.zeros_like(acc_ref)

    acc_ref[...] += jnp.dot(a_ref[...], b_ref[...],
                            preferred_element_type=jnp.float32)

    @pl.when(k == pl.num_programs(1) - 1)
    def _():
        h = jnp.dot(acc_ref[...], w_ref[...],
                    preferred_element_type=jnp.float32) + bias_ref[...]
        h = jnp.maximum(h, 0.0)
        # dropout: identity (eval mode)
        out_ref[...] = h.astype(out_ref.dtype)


def _gcn_layer_fc_kernel(a_ref, b_ref, w_ref, bias_ref, wf_ref, bf_ref,
                         out_ref, acc_ref):
    """out = sigmoid(relu((A @ B) @ W + bias) @ W_fc + b_fc)."""
    k = pl.program_id(1)

    @pl.when(k == 0)
    def _():
        acc_ref[...] = jnp.zeros_like(acc_ref)

    acc_ref[...] += jnp.dot(a_ref[...], b_ref[...],
                            preferred_element_type=jnp.float32)

    @pl.when(k == pl.num_programs(1) - 1)
    def _():
        h = jnp.dot(acc_ref[...], w_ref[...],
                    preferred_element_type=jnp.float32) + bias_ref[...]
        h = jnp.maximum(h, 0.0)
        # dropout: identity (eval mode)
        logits = jnp.dot(h, wf_ref[...],
                         preferred_element_type=jnp.float32) + bf_ref[...]
        out_ref[...] = jax.nn.sigmoid(logits).astype(out_ref.dtype)


# --------------------------------------------------------------------------
# Tiled layer wrapper (one pallas_call per GCN layer)
# --------------------------------------------------------------------------
def _gcn_layer(a_hat, b, w, bias, *, tm, tk, out_dtype, fc=None):
    n_pad = a_hat.shape[0]
    fb = b.shape[1]          # streamed-operand feature width
    f_mid = w.shape[1]       # post-projection width

    if fc is None:
        kernel = _gcn_layer_fc_kernel if False else _gcn_layer_kernel
        f_out = f_mid
        extra_in = ()
        extra_specs = []
    else:
        kernel = _gcn_layer_fc_kernel
        w_fc, b_fc = fc
        f_out = w_fc.shape[1]
        extra_in = (w_fc, b_fc)
        extra_specs = [
            pl.BlockSpec((f_mid, f_out), lambda i, k: (0, 0)),
            pl.BlockSpec((1, f_out), lambda i, k: (0, 0)),
        ]

    grid = (n_pad // tm, n_pad // tk)

    return pl.pallas_call(
        kernel,
        out_shape=jax.ShapeDtypeStruct((n_pad, f_out), out_dtype),
        grid=grid,
        in_specs=[
            pl.BlockSpec((tm, tk), lambda i, k: (i, k)),   # A_hat tile
            pl.BlockSpec((tk, fb), lambda i, k: (k, 0)),   # X / h1 tile
            pl.BlockSpec((fb, f_mid), lambda i, k: (0, 0)),  # W (resident)
            pl.BlockSpec((1, f_mid), lambda i, k: (0, 0)),   # bias (resident)
        ] + extra_specs,
        out_specs=pl.BlockSpec((tm, f_out), lambda i, k: (i, 0)),
        scratch_shapes=[pltpu.VMEM((tm, fb), jnp.float32)],
        compiler_params=pltpu.CompilerParams(
            dimension_semantics=("parallel", "arbitrary"),
            vmem_limit_bytes=64 * 1024 * 1024,
        ),
    )(a_hat, b, w, bias, *extra_in)


# --------------------------------------------------------------------------
# Forward pass
# --------------------------------------------------------------------------
def gnn_overlapping_forward(x, edge_index, params, *, tm=256, tk=512):
    """x: [N, F_in] float32, edge_index: [2, E] int32."""
    n, _ = x.shape
    n_comm = params["w_fc"].shape[1]

    # ---- glue (plain XLA): dense symmetric-normalized adjacency ----
    src = edge_index[0]
    dst = edge_index[1]
    adj = jnp.zeros((n, n), jnp.float32).at[dst, src].add(1.0)  # sum dup edges
    diag = jnp.diagonal(adj)
    adj = adj + jnp.diag(jnp.where(diag > 0, 0.0, 1.0))  # add_remaining_self_loops
    deg = jnp.sum(adj, axis=1)
    dinv = jnp.where(deg > 0, jax.lax.rsqrt(deg), 0.0)
    a_hat = dinv[:, None] * adj * dinv[None, :]

    # ---- pick tiles / pad node dim to tile multiple ----
    n128 = _round_up(n, 128)
    tm = min(tm, n128)
    tk = min(tk, n128)
    n_pad = _round_up(n, math.lcm(tm, tk))
    pad_n = n_pad - n

    a_hat_p = jnp.pad(a_hat, ((0, pad_n), (0, pad_n))).astype(jnp.bfloat16)
    x_p = jnp.pad(x, ((0, pad_n), (0, 0))).astype(jnp.bfloat16)

    # lane-dense fc output: pad n_comm -> multiple of 128
    n_comm_pad = _round_up(n_comm, 128)
    w_fc_p = jnp.pad(params["w_fc"], ((0, 0), (0, n_comm_pad - n_comm)))
    b_fc_p = jnp.pad(params["b_fc"], ((0, 0), (0, n_comm_pad - n_comm)))

    # layer 1: h1 = relu((A @ X) @ W1 + b1)   (stored bf16 for the next stream)
    h1 = _gcn_layer(a_hat_p, x_p, params["w1"], params["b1"],
                    tm=tm, tk=tk, out_dtype=jnp.bfloat16)

    # layer 2 + fc + sigmoid fused in the epilogue
    out_p = _gcn_layer(a_hat_p, h1, params["w2"], params["b2"],
                       tm=tm, tk=tk, out_dtype=jnp.float32,
                       fc=(w_fc_p, b_fc_p))

    return out_p[:n, :n_comm]


def init_params(key, input_dim, hidden_dim, n_communities):
    k1, k2, k3 = jax.random.split(key, 3)
    # Weights stored [in, out]; biases kept 2D (1, out) for clean VMEM layout.
    return {
        "w1": (jax.random.normal(k1, (input_dim, hidden_dim), jnp.float32)
               * (1.0 / jnp.sqrt(input_dim))),
        "b1": jnp.zeros((1, hidden_dim), jnp.float32),
        "w2": (jax.random.normal(k2, (hidden_dim, hidden_dim), jnp.float32)
               * (1.0 / jnp.sqrt(hidden_dim))),
        "b2": jnp.zeros((1, hidden_dim), jnp.float32),
        "w_fc": (jax.random.normal(k3, (hidden_dim, n_communities), jnp.float32)
                 * (1.0 / jnp.sqrt(hidden_dim))),
        "b_fc": jnp.full((1, n_communities), 0.01, jnp.float32),
    }


def _reference_forward(x, edge_index, params):
    """Pure-JAX f32 reference for correctness checking."""
    n = x.shape[0]
    src, dst = edge_index[0], edge_index[1]
    adj = jnp.zeros((n, n), jnp.float32).at[dst, src].add(1.0)
    diag = jnp.diagonal(adj)
    adj = adj + jnp.diag(jnp.where(diag > 0, 0.0, 1.0))
    deg = jnp.sum(adj, axis=1)
    dinv = jnp.where(deg > 0, jax.lax.rsqrt(deg), 0.0)
    a_hat = dinv[:, None] * adj * dinv[None, :]
    h1 = jnp.maximum(a_hat @ (x @ params["w1"]) + params["b1"], 0.0)
    h2 = jnp.maximum(a_hat @ (h1 @ params["w2"]) + params["b2"], 0.0)
    return jax.nn.sigmoid(h2 @ params["w_fc"] + params["b_fc"])


if __name__ == "__main__":
    N = 32          # nodes
    INPUT_DIM = 16
    HIDDEN_DIM = 32
    N_COMM = 8
    E = 64          # directed edges

    key = jax.random.PRNGKey(0)
    kx, ke, kp = jax.random.split(key, 3)

    x = jax.random.normal(kx, (N, INPUT_DIM), jnp.float32)
    edge_index = jax.random.randint(ke, (2, E), 0, N, dtype=jnp.int32)
    params = init_params(kp, INPUT_DIM, HIDDEN_DIM, N_COMM)

    out = gnn_overlapping_forward(x, edge_index, params)
    out = jax.block_until_ready(out)

    assert out.shape == (N, N_COMM)
    assert bool(jnp.all(jnp.isfinite(out)))
    assert bool(jnp.all((out >= 0.0) & (out <= 1.0)))

    # loose tolerance: A_hat / activations are streamed in bf16
    ref = _reference_forward(x, edge_index, params)
    assert bool(jnp.max(jnp.abs(out - ref)) < 0.1)

    print("KERNEL_OK")
</pallas_src>

<mosaic_0001>
module attributes {stable_mosaic.version = 11 : i64} {
  func.func @_gcn_layer_kernel(%arg0: i32, %arg1: i32, %arg2: memref<128x128xbf16, #tpu.memory_space<vmem>>, %arg3: memref<128x16xbf16, #tpu.memory_space<vmem>>, %arg4: memref<16x32xf32, #tpu.memory_space<vmem>>, %arg5: memref<1x32xf32, #tpu.memory_space<vmem>>, %arg6: memref<128x32xbf16, #tpu.memory_space<vmem>>, %arg7: memref<128x16xf32, #tpu.memory_space<vmem>>) attributes {dimension_semantics = [#tpu.dimension_semantics<parallel>, #tpu.dimension_semantics<arbitrary>], iteration_bounds = array<i64: 1, 1>, scalar_prefetch = 0 : i64, scratch_operands = 1 : i64, tpu.core_type = #tpu.core_type<tc>, window_params = [{transform_indices = @transform_0, window_bounds = array<i64: 128, 128>}, {transform_indices = @transform_1, window_bounds = array<i64: 128, 16>}, {pipeline_mode = #tpu.pipeline_mode<synchronous>, transform_indices = @transform_2, window_bounds = array<i64: 16, 32>}, {pipeline_mode = #tpu.pipeline_mode<synchronous>, transform_indices = @transform_3, window_bounds = array<i64: 1, 32>}, {transform_indices = @transform_4, window_bounds = array<i64: 128, 32>}]} {
    %c0_i32 = arith.constant 0 : i32
    %0 = arith.cmpi eq, %arg1, %c0_i32 : i32
    %1 = arith.extui %0 : i1 to i32
    %c0_i32_0 = arith.constant 0 : i32
    %2 = arith.cmpi ne, %1, %c0_i32_0 : i32
    scf.if %2 {
      %cst_10 = arith.constant 0.000000e+00 : f32
      %12 = vector.broadcast %cst_10 : f32 to vector<128x16xf32>
      %c0_11 = arith.constant 0 : index
      %c0_12 = arith.constant 0 : index
      %13 = vector.load %arg7[%c0_11, %c0_12] : memref<128x16xf32, #tpu.memory_space<vmem>>, vector<128x16xf32>
      tpu.vector_store %arg7[%c0_11, %c0_12], %12 {strides = array<i32>} : memref<128x16xf32, #tpu.memory_space<vmem>>, vector<128x16xf32>,
    } else {
    }
    %c0 = arith.constant 0 : index
    %c0_1 = arith.constant 0 : index
    %3 = vector.load %arg7[%c0, %c0_1] : memref<128x16xf32, #tpu.memory_space<vmem>>, vector<128x16xf32>
    %c0_2 = arith.constant 0 : index
    %c0_3 = arith.constant 0 : index
    %4 = vector.load %arg2[%c0_2, %c0_3] : memref<128x128xbf16, #tpu.memory_space<vmem>>, vector<128x128xbf16>
    %c0_4 = arith.constant 0 : index
    %c0_5 = arith.constant 0 : index
    %5 = vector.load %arg3[%c0_4, %c0_5] : memref<128x16xbf16, #tpu.memory_space<vmem>>, vector<128x16xbf16>
    %cst = arith.constant dense<0.000000e+00> : vector<128x16xf32>
    %6 = tpu.matmul %4, %5, %cst {dimension_numbers = #tpu.dot_dimension_numbers<[1], [0], [0], [1], [0, 0, 1, 1], [], []>} : vector<128x128xbf16>, vector<128x16xbf16>, vector<128x16xf32> -> vector<128x16xf32>
    %7 = arith.addf %3, %6 : vector<128x16xf32>
    %c0_6 = arith.constant 0 : index
    %c0_7 = arith.constant 0 : index
    %8 = vector.load %arg7[%c0_6, %c0_7] : memref<128x16xf32, #tpu.memory_space<vmem>>, vector<128x16xf32>
    tpu.vector_store %arg7[%c0_6, %c0_7], %7 {strides = array<i32>} : memref<128x16xf32, #tpu.memory_space<vmem>>, vector<128x16xf32>,
    %c0_i32_8 = arith.constant 0 : i32
    %9 = arith.cmpi eq, %arg1, %c0_i32_8 : i32
    %10 = arith.extui %9 : i1 to i32
    %c0_i32_9 = arith.constant 0 : i32
    %11 = arith.cmpi ne, %10, %c0_i32_9 : i32
    scf.if %11 {
      %c0_10 = arith.constant 0 : index
      %c0_11 = arith.constant 0 : index
      %12 = vector.load %arg7[%c0_10, %c0_11] : memref<128x16xf32, #tpu.memory_space<vmem>>, vector<128x16xf32>
      %c0_12 = arith.constant 0 : index
      %c0_13 = arith.constant 0 : index
      %13 = vector.load %arg4[%c0_12, %c0_13] : memref<16x32xf32, #tpu.memory_space<vmem>>, vector<16x32xf32>
      %cst_14 = arith.constant dense<0.000000e+00> : vector<128x32xf32>
      %14 = tpu.matmul %12, %13, %cst_14 {dimension_numbers = #tpu.dot_dimension_numbers<[1], [0], [0], [1], [0, 0, 1, 1], [], []>} : vector<128x16xf32>, vector<16x32xf32>, vector<128x32xf32> -> vector<128x32xf32>
      %c0_15 = arith.constant 0 : index
      %c0_16 = arith.constant 0 : index
      %15 = vector.load %arg5[%c0_15, %c0_16] : memref<1x32xf32, #tpu.memory_space<vmem>>, vector<1x32xf32>
      %16 = vector.broadcast %15 : vector<1x32xf32> to vector<128x32xf32>
      %17 = arith.addf %14, %16 : vector<128x32xf32>
      %cst_17 = arith.constant 0.000000e+00 : f32
      %18 = vector.broadcast %cst_17 : f32 to vector<128x32xf32>
      %19 = arith.maximumf %17, %18 : vector<128x32xf32>
      %20 = arith.truncf %19 : vector<128x32xf32> to vector<128x32xbf16>
      %c0_18 = arith.constant 0 : index
      %c0_19 = arith.constant 0 : index
      %21 = vector.load %arg6[%c0_18, %c0_19] : memref<128x32xbf16, #tpu.memory_space<vmem>>, vector<128x32xbf16>
      tpu.vector_store %arg6[%c0_18, %c0_19], %20 {strides = array<i32>} : memref<128x32xbf16, #tpu.memory_space<vmem>>, vector<128x32xbf16>,
    } else {
    }
    return
  }
  func.func @transform_0(%arg0: i32, %arg1: i32) -> (i32, i32) {
    %c0_i32 = arith.constant 0 : i32
    return %arg0, %arg1 : i32, i32
  }
  func.func @transform_1(%arg0: i32, %arg1: i32) -> (i32, i32) {
    %c0_i32 = arith.constant 0 : i32
    %c0_i32_0 = arith.constant 0 : i32
    return %arg1, %c0_i32 : i32, i32
  }
  func.func @transform_2(%arg0: i32, %arg1: i32) -> (i32, i32) {
    %c0_i32 = arith.constant 0 : i32
    %c0_i32_0 = arith.constant 0 : i32
    %c0_i32_1 = arith.constant 0 : i32
    return %c0_i32, %c0_i32_0 : i32, i32
  }
  func.func @transform_3(%arg0: i32, %arg1: i32) -> (i32, i32) {
    %c0_i32 = arith.constant 0 : i32
    %c0_i32_0 = arith.constant 0 : i32
    %c0_i32_1 = arith.constant 0 : i32
    return %c0_i32, %c0_i32_0 : i32, i32
  }
  func.func @transform_4(%arg0: i32, %arg1: i32) -> (i32, i32) {
    %c0_i32 = arith.constant 0 : i32
    %c0_i32_0 = arith.constant 0 : i32
    return %arg0, %c0_i32 : i32, i32
  }
}

</mosaic_0001>

<bundles_post_ra>
// kernel: tpu_custom_call.1
= control target key start
LH: loop header
LB: loop body
LE: loop exit
PB: predicated region body
PF: predicated region fallthrough
CT: control target
= control target key end

     0   :  { %9 = vsyncpa [#allocation4], 0  ;;  %s851_s15 = smov [#allocation3]   ;;  %s1064_s0 = inlined_call_operand.vmem [shape: bf16[128,128], index: 0, kind: input, shape index: {}]   ;;  %s1065_s1 = inlined_call_operand.vmem [shape: bf16[128,16], index: 1, kind: input, shape index: {}]   ;;  %s1066_s2 = inlined_call_operand.hbm [shape: f32[16,32], index: 2, kind: input, shape index: {}]   ;;  %s1067_s3 = inlined_call_operand.vmem [shape: f32[1,32], index: 3, kind: input, shape index: {}]   ;;  %s1068_s4 = inlined_call_operand.vmem [shape: bf16[128,32], index: 4, kind: output, shape index: {}]  }
   0x1   :  { %s19_s16 = sshll.u32 %s851_s15, 4  ;;  %s20_s16 = int_to_ptr.vmem [resolvable:$true] %s19_s16 }
   0x2   :  { %s837_s17 = scalar_lea.vmem %s20_s16, 256  ;;  %p842_p1 = scmp.lt.s32.totalorder %s20_s16, %s20_s16 }
   0x3   :  { %p838_p0 = scmp.ne.s32.totalorder %s20_s16, %s837_s17  ;;  %p843_p2 = scmp.lt.s32.totalorder %s837_s17, %s837_s17 }
   0x5   :  { %p844_p3 = por %p843_p2, %p842_p1 }
   0x7   :  { %p845_p4 = pnand %p844_p3, %p838_p0 }
   0x9   :  { %848 = shalt.err (!%p845_p4)
}
   0xa   :  { %s852_s18 = smov 128   ;;  %s853_s19 = smov 8  }
   0xb   :  { %25 = dma.hbm_to_vmem [thread:$0]  %s1066_s2, 256, %s20_s16, [#allocation4], %s852_s18, %s852_s18, %s853_s19  }
   0xc   :  { %849 = dma.done.wait [#allocation4], 256  }
   0xd   :  { %850 = vsyncadd [#allocation4], 4294967040  ;;  %vm36_vm0 = vcmask 130048   ;;  %v854_v0 = vmov 0.0   ;;  %v813_v1 = vld [vmem:[%s1065_s1 + $0x38] sm:$0xff]   ;;  %v814_v2 = vld [vmem:[%s1065_s1 + $0x30] sm:$0xff]  }
   0xe   :  { %39 = vst.msk [vmem:[#allocation2 + $0x10] sm:$0xff] %vm36_vm0, %v854_v0  ;;  %37 = vst.msk [vmem:[#allocation2] sm:$0xff] %vm36_vm0, %v854_v0  ;;  %749 = vmatprep.subr.bf16.mxu0 %v813_v1  ;;  %v815_v3 = vld [vmem:[%s1065_s1 + $0x28] sm:$0xff]   ;;  %v816_v4 = vld [vmem:[%s1065_s1 + $0x20] sm:$0xff]   ;;  %vm628_vm1 = vcmask 257024  }
   0xf   :  { %38 = vst.msk [vmem:[#allocation2 + $0x8] sm:$0xff] %vm36_vm0, %v854_v0  ;;  %40 = vst.msk [vmem:[#allocation2 + $0x18] sm:$0xff] %vm36_vm0, %v854_v0  ;;  %750 = vmatpush3.bf16.msra.mxu0 %v813_v1  ;;  %v821_v5 = vld [vmem:[%s1064_s0] sm:$0xff]   ;;  %v817_v6 = vld [vmem:[%s1065_s1 + $0x18] sm:$0xff]  }
  0x10   :  { %41 = vst.msk [vmem:[#allocation2 + $0x20] sm:$0xff] %vm36_vm0, %v854_v0  ;;  %42 = vst.msk [vmem:[#allocation2 + $0x28] sm:$0xff] %vm36_vm0, %v854_v0  ;;  %751 = vmatprep.subr.bf16.mxu0 %v814_v2  ;;  %765 = vmatprep.mubr.bf16.mxu0 %v821_v5  ;;  %v818_v7 = vld [vmem:[%s1065_s1 + $0x10] sm:$0xff]   ;;  %v819_v8 = vld [vmem:[%s1065_s1 + $0x8] sm:$0xff]  }
  0x11   :  { %43 = vst.msk [vmem:[#allocation2 + $0x30] sm:$0xff] %vm36_vm0, %v854_v0  ;;  %44 = vst.msk [vmem:[#allocation2 + $0x38] sm:$0xff] %vm36_vm0, %v854_v0  ;;  %v820_v9 = vld [vmem:[%s1065_s1] sm:$0xff]   ;;  %v822_v10 = vld [vmem:[%s1064_s0 + $0x8] sm:$0xff]  }
  0x12   :  { %45 = vst.msk [vmem:[#allocation2 + $0x40] sm:$0xff] %vm36_vm0, %v854_v0  ;;  %46 = vst.msk [vmem:[#allocation2 + $0x48] sm:$0xff] %vm36_vm0, %v854_v0  ;;  %v823_v11 = vld [vmem:[%s1064_s0 + $0x10] sm:$0xff]   ;;  %v824_v12 = vld [vmem:[%s1064_s0 + $0x18] sm:$0xff]  }
  0x13   :  { %47 = vst.msk [vmem:[#allocation2 + $0x50] sm:$0xff] %vm36_vm0, %v854_v0  ;;  %48 = vst.msk [vmem:[#allocation2 + $0x58] sm:$0xff] %vm36_vm0, %v854_v0  ;;  %752 = vmatpush3.bf16.msra.mxu0 %v814_v2  ;;  %v825_v13 = vld [vmem:[%s1064_s0 + $0x20] sm:$0xff]   ;;  %v826_v14 = vld [vmem:[%s1064_s0 + $0x28] sm:$0xff]  }
  0x14   :  { %49 = vst.msk [vmem:[#allocation2 + $0x60] sm:$0xff] %vm36_vm0, %v854_v0  ;;  %50 = vst.msk [vmem:[#allocation2 + $0x68] sm:$0xff] %vm36_vm0, %v854_v0  ;;  %753 = vmatprep.subr.bf16.mxu0 %v815_v3  ;;  %v827_v15 = vld [vmem:[%s1064_s0 + $0x30] sm:$0xff]   ;;  %v828_v16 = vld [vmem:[%s1064_s0 + $0x38] sm:$0xff]  }
  0x15   :  { %51 = vst.msk [vmem:[#allocation2 + $0x70] sm:$0xff] %vm36_vm0, %v854_v0  ;;  %52 = vst.msk [vmem:[#allocation2 + $0x78] sm:$0xff] %vm36_vm0, %v854_v0  ;;  %v347_v17 = vld [vmem:[#allocation3 + $0x8] sm:$0xff]  ;;  %v346_v18 = vld [vmem:[#allocation3] sm:$0xff] }
  0x16   :  { %781 = vmatprep.subr.mxu1 %v347_v17  ;;  %v55_v19 = vld [vmem:[#allocation2 + $0x10] sm:$0xff]  ;;  %v53_v21 = vld [vmem:[#allocation2] sm:$0xff]  ;;  %v56_v24 = vld [vmem:[#allocation2 + $0x18] sm:$0xff] }
  0x17   :  { %754 = vmatpush3.bf16.msra.mxu0 %v815_v3  ;;  %782 = vmatpush3.msra.mxu1 %v347_v17  ;;  %v54_v27 = vld [vmem:[#allocation2 + $0x8] sm:$0xff]  ;;  %v57_v33 = vld [vmem:[#allocation2 + $0x20] sm:$0xff] }
  0x18   :  { %755 = vmatprep.subr.bf16.mxu0 %v816_v4  ;;  %783 = vmatprep.subr.mxu1 %v346_v18  ;;  %v59_v30 = vld [vmem:[#allocation2 + $0x30] sm:$0xff]  ;;  %v60_v36 = vld [vmem:[#allocation2 + $0x38] sm:$0xff]  ;;  %v58_v40 = vld [vmem:[#allocation2 + $0x28] sm:$0xff] }
  0x19   :  { %784 = vmatpush3.msra.mxu1 %v346_v18  ;;  %v61_v47 = vld [vmem:[#allocation2 + $0x40] sm:$0xff]  ;;  %v62_v55 = vld [vmem:[#allocation2 + $0x48] sm:$0xff] }
  0x1a   :  { %v63_v43 = vld [vmem:[#allocation2 + $0x50] sm:$0xff]  ;;  %v64_v51 = vld [vmem:[#allocation2 + $0x58] sm:$0xff] }
  0x1b   :  { %756 = vmatpush3.bf16.msra.mxu0 %v816_v4  ;;  %v65_v63 = vld [vmem:[#allocation2 + $0x60] sm:$0xff] }
  0x1c   :  { %757 = vmatprep.subr.bf16.mxu0 %v817_v6  ;;  %v67_v59 = vld [vmem:[#allocation2 + $0x70] sm:$0xff]  ;;  %v68_v3 = vld [vmem:[#allocation2 + $0x78] sm:$0xff] }
  0x1f   :  { %758 = vmatpush3.bf16.msra.mxu0 %v817_v6 }
  0x20   :  { %759 = vmatprep.subr.bf16.mxu0 %v818_v7 }
  0x23   :  { %760 = vmatpush3.bf16.msra.mxu0 %v818_v7  ;;  %v66_v7 = vld [vmem:[#allocation2 + $0x68] sm:$0xff] }
  0x24   :  { %761 = vmatprep.subr.bf16.mxu0 %v819_v8 }
  0x27   :  { %762 = vmatpush3.bf16.msra.mxu0 %v819_v8 }
  0x28   :  { %763 = vmatprep.subr.bf16.mxu0 %v820_v9 }
  0x2b   :  { %764 = vmatpush3.bf16.msra.mxu0 %v820_v9 }
  0x2e   :  { %766 = vmatmul.mubr.bf16.vlgmr.msra.gmra.mxu0 %v822_v10 }
  0x2f   :  { %769 = vmatprep.mubr.bf16.mxu0 %v823_v11 }
  0x36   :  { %770 = vmatmul.mubr.bf16.gmra.mxu0 %v824_v12 }
  0x37   :  { %773 = vmatprep.mubr.bf16.mxu0 %v825_v13 }
  0x3e   :  { %774 = vmatmul.mubr.bf16.gmra.mxu0 %v826_v14 }
  0x3f   :  { %777 = vmatprep.mubr.bf16.mxu0 %v827_v15 }
  0x46   :  { %778 = vmatmul.mubr.bf16.gmra.mxu0 %v828_v16 }
  0xee   :  { %v767_v20 = vpop.f32.mrf.mxu0 }
  0xef   :  { %v296_v22 = vadd.f32 %v767_v20, %v55_v19  ;;  %v982_v19 = vld [vmem:[%s1067_s3] ss:$0 sm:$0xff] }
  0xf0   :  { %v231_v23 = vpop.f32.mrf.mxu0 }
  0xf1   :  { %313 = vst.msk [vmem:[#allocation2 + $0x10] sm:$0xff] %vm36_vm0, %v296_v22  ;;  %v294_v25 = vadd.f32 %v231_v23, %v53_v21 }
  0xf2   :  { %v768_v26 = vpop.f32.mrf.mxu0 }
  0xf3   :  { %311 = vst.msk [vmem:[#allocation2] sm:$0xff] %vm36_vm0, %v294_v25  ;;  %v297_v28 = vadd.f32 %v768_v26, %v56_v24 }
  0xf4   :  { %v234_v29 = vpop.f32.mrf.mxu0 }
  0xf5   :  { %314 = vst.msk [vmem:[#allocation2 + $0x18] sm:$0xff] %vm36_vm0, %v297_v28  ;;  %v295_v31 = vadd.f32 %v234_v29, %v54_v27 }
  0xf6   :  { %v771_v32 = vpop.f32.mrf.mxu0 }
  0xf7   :  { %312 = vst.msk [vmem:[#allocation2 + $0x8] sm:$0xff] %vm36_vm0, %v295_v31  ;;  %v300_v34 = vadd.f32 %v771_v32, %v59_v30 }
  0xf8   :  { %v247_v35 = vpop.f32.mrf.mxu0  ;;  %v332_v49 = vld [vmem:[#allocation2 + $0x10] sm:$0xff] }
  0xf9   :  { %317 = vst.msk [vmem:[#allocation2 + $0x30] sm:$0xff] %vm36_vm0, %v300_v34  ;;  %v298_v37 = vadd.f32 %v247_v35, %v57_v33 }
  0xfa   :  { %v772_v38 = vpop.f32.mrf.mxu0  ;;  %v330_v39 = vld [vmem:[#allocation2] sm:$0xff] }
  0xfb   :  { %315 = vst.msk [vmem:[#allocation2 + $0x20] sm:$0xff] %vm36_vm0, %v298_v37  ;;  %v301_v41 = vadd.f32 %v772_v38, %v60_v36  ;;  %785 = vmatprep.mubr.msk.f32.mxu1 %vm36_vm0, %v330_v39 }
  0xfc   :  { %v250_v42 = vpop.f32.mrf.mxu0  ;;  %v333_v54 = vld [vmem:[#allocation2 + $0x18] sm:$0xff] }
  0xfd   :  { %318 = vst.msk [vmem:[#allocation2 + $0x38] sm:$0xff] %vm36_vm0, %v301_v41  ;;  %v299_v44 = vadd.f32 %v250_v42, %v58_v40 }
  0xfe   :  { %v775_v45 = vpop.f32.mrf.mxu0  ;;  %v331_v46 = vld [vmem:[#allocation2 + $0x8] sm:$0xff] }
  0xff   :  { %316 = vst.msk [vmem:[#allocation2 + $0x28] sm:$0xff] %vm36_vm0, %v299_v44  ;;  %v304_v48 = vadd.f32 %v775_v45, %v63_v43  ;;  %786 = vmatmul.mubr.msk.f32.vlgmr.msra.gmra.mxu1 %vm36_vm0, %v331_v46 }
 0x100   :  { %v263_v50 = vpop.f32.mrf.mxu0  ;;  %788 = vmatprep.mubr.msk.f32.mxu1 %vm36_vm0, %v332_v49  ;;  %v336_v1 = vld [vmem:[#allocation2 + $0x30] sm:$0xff] }
 0x101   :  { %321 = vst.msk [vmem:[#allocation2 + $0x50] sm:$0xff] %vm36_vm0, %v304_v48  ;;  %v302_v52 = vadd.f32 %v263_v50, %v61_v47 }
 0x102   :  { %v776_v53 = vpop.f32.mrf.mxu0  ;;  %v334_v56 = vld [vmem:[#allocation2 + $0x20] sm:$0xff] }
 0x103   :  { %319 = vst.msk [vmem:[#allocation2 + $0x40] sm:$0xff] %vm36_vm0, %v302_v52  ;;  %v305_v57 = vadd.f32 %v776_v53, %v64_v51  ;;  %789 = vmatmul.mubr.msk.f32.gmra.mxu1 %vm36_vm0, %v333_v54 }
 0x104   :  { %v266_v58 = vpop.f32.mrf.mxu0  ;;  %791 = vmatprep.mubr.msk.f32.mxu1 %vm36_vm0, %v334_v56  ;;  %v337_v6 = vld [vmem:[#allocation2 + $0x38] sm:$0xff] }
 0x105   :  { %322 = vst.msk [vmem:[#allocation2 + $0x58] sm:$0xff] %vm36_vm0, %v305_v57  ;;  %v303_v60 = vadd.f32 %v266_v58, %v62_v55 }
 0x106   :  { %v779_v61 = vpop.f32.mrf.mxu0  ;;  %v335_v62 = vld [vmem:[#allocation2 + $0x28] sm:$0xff] }
 0x107   :  { %320 = vst.msk [vmem:[#allocation2 + $0x48] sm:$0xff] %vm36_vm0, %v303_v60  ;;  %v308_v0 = vadd.f32 %v779_v61, %v67_v59  ;;  %792 = vmatmul.mubr.msk.f32.gmra.mxu1 %vm36_vm0, %v335_v62 }
 0x108   :  { %v279_v2 = vpop.f32.mrf.mxu0  ;;  %794 = vmatprep.mubr.msk.f32.mxu1 %vm36_vm0, %v336_v1  ;;  %v340_v13 = vld [vmem:[#allocation2 + $0x50] sm:$0xff] }
 0x109   :  { %325 = vst.msk [vmem:[#allocation2 + $0x70] sm:$0xff] %vm36_vm0, %v308_v0  ;;  %v306_v4 = vadd.f32 %v279_v2, %v65_v63 }
 0x10a   :  { %v780_v5 = vpop.f32.mrf.mxu0  ;;  %v338_v8 = vld [vmem:[#allocation2 + $0x40] sm:$0xff] }
 0x10b   :  { %323 = vst.msk [vmem:[#allocation2 + $0x60] sm:$0xff] %vm36_vm0, %v306_v4  ;;  %v309_v9 = vadd.f32 %v780_v5, %v68_v3  ;;  %795 = vmatmul.mubr.msk.f32.gmra.mxu1 %vm36_vm0, %v337_v6 }
 0x10c   :  { %v282_v10 = vpop.f32.mrf.mxu0  ;;  %797 = vmatprep.mubr.msk.f32.mxu1 %vm36_vm0, %v338_v8  ;;  %v341_v14 = vld [vmem:[#allocation2 + $0x58] sm:$0xff] }
 0x10d   :  { %326 = vst.msk [vmem:[#allocation2 + $0x78] sm:$0xff] %vm36_vm0, %v309_v9  ;;  %v307_v11 = vadd.f32 %v282_v10, %v66_v7 }
 0x10e   :  { %v339_v12 = vld [vmem:[#allocation2 + $0x48] sm:$0xff] }
 0x10f   :  { %324 = vst.msk [vmem:[#allocation2 + $0x68] sm:$0xff] %vm36_vm0, %v307_v11  ;;  %798 = vmatmul.mubr.msk.f32.gmra.mxu1 %vm36_vm0, %v339_v12 }
 0x110   :  { %800 = vmatprep.mubr.msk.f32.mxu1 %vm36_vm0, %v340_v13  ;;  %v344_v17 = vld [vmem:[#allocation2 + $0x70] sm:$0xff] }
 0x112   :  { %v342_v15 = vld [vmem:[#allocation2 + $0x60] sm:$0xff] }
 0x113   :  { %801 = vmatmul.mubr.msk.f32.gmra.mxu1 %vm36_vm0, %v341_v14 }
 0x114   :  { %803 = vmatprep.mubr.msk.f32.mxu1 %vm36_vm0, %v342_v15  ;;  %v345_v18 = vld [vmem:[#allocation2 + $0x78] sm:$0xff] }
 0x116   :  { %v343_v16 = vld [vmem:[#allocation2 + $0x68] sm:$0xff] }
 0x117   :  { %804 = vmatmul.mubr.msk.f32.gmra.mxu1 %vm36_vm0, %v343_v16 }
 0x118   :  { %806 = vmatprep.mubr.msk.f32.mxu1 %vm36_vm0, %v344_v17 }
 0x11b   :  { %807 = vmatmul.mubr.msk.f32.gmra.mxu1 %vm36_vm0, %v345_v18 }
 0x1bf   :  { %v787_v20 = vpop.f32.mrf.mxu1 }
 0x1c0   :  { %v475_v21 = vadd.f32 %v787_v20, %v982_v19 }
 0x1c1   :  { %v469_v22 = vpop.f32.mrf.mxu1 }
 0x1c2   :  { %v549_v23 = vmax.f32 %v475_v21, 0.0  ;;  %v470_v24 = vadd.f32 %v982_v19, %v469_v22 }
 0x1c3   :  { %v790_v25 = vpop.f32.mrf.mxu1 }
 0x1c4   :  { %v700_v26 = vpack.c.bf16 %v549_v23, %v549_v23  ;;  %v548_v27 = vmax.f32 %v470_v24, 0.0  ;;  %v485_v28 = vadd.f32 %v790_v25, %v982_v19 }
 0x1c5   :  { %v479_v29 = vpop.f32.mrf.mxu1 }
 0x1c6   :  { %630 = vst.msk [vmem:[%s1068_s4 + $0x4] sm:$0xf] %vm628_vm1, %v700_v26  ;;  %v699_v30 = vpack.c.bf16 %v548_v27, %v548_v27  ;;  %v551_v31 = vmax.f32 %v485_v28, 0.0  ;;  %v480_v32 = vadd.f32 %v982_v19, %v479_v29 }
 0x1c7   :  { %v793_v33 = vpop.f32.mrf.mxu1 }
 0x1c8   :  { %629 = vst.msk [vmem:[%s1068_s4] sm:$0xf] %vm628_vm1, %v699_v30  ;;  %v702_v34 = vpack.c.bf16 %v551_v31, %v551_v31  ;;  %v550_v35 = vmax.f32 %v480_v32, 0.0  ;;  %v495_v36 = vadd.f32 %v793_v33, %v982_v19 }
 0x1c9   :  { %v489_v37 = vpop.f32.mrf.mxu1 }
 0x1ca   :  { %632 = vst.msk [vmem:[%s1068_s4 + $0xc] sm:$0xf] %vm628_vm1, %v702_v34  ;;  %v701_v38 = vpack.c.bf16 %v550_v35, %v550_v35  ;;  %v553_v39 = vmax.f32 %v495_v36, 0.0  ;;  %v490_v40 = vadd.f32 %v982_v19, %v489_v37 }
 0x1cb   :  { %v796_v41 = vpop.f32.mrf.mxu1 }
 0x1cc   :  { %631 = vst.msk [vmem:[%s1068_s4 + $0x8] sm:$0xf] %vm628_vm1, %v701_v38  ;;  %v704_v42 = vpack.c.bf16 %v553_v39, %v553_v39  ;;  %v552_v43 = vmax.f32 %v490_v40, 0.0  ;;  %v505_v44 = vadd.f32 %v796_v41, %v982_v19 }
 0x1cd   :  { %v499_v45 = vpop.f32.mrf.mxu1 }
 0x1ce   :  { %634 = vst.msk [vmem:[%s1068_s4 + $0x14] sm:$0xf] %vm628_vm1, %v704_v42  ;;  %v703_v46 = vpack.c.bf16 %v552_v43, %v552_v43  ;;  %v555_v47 = vmax.f32 %v505_v44, 0.0  ;;  %v500_v48 = vadd.f32 %v982_v19, %v499_v45 }
 0x1cf   :  { %v799_v49 = vpop.f32.mrf.mxu1 }
 0x1d0   :  { %633 = vst.msk [vmem:[%s1068_s4 + $0x10] sm:$0xf] %vm628_vm1, %v703_v46  ;;  %v706_v50 = vpack.c.bf16 %v555_v47, %v555_v47  ;;  %v554_v51 = vmax.f32 %v500_v48, 0.0  ;;  %v515_v52 = vadd.f32 %v799_v49, %v982_v19 }
 0x1d1   :  { %v509_v53 = vpop.f32.mrf.mxu1 }
 0x1d2   :  { %636 = vst.msk [vmem:[%s1068_s4 + $0x1c] sm:$0xf] %vm628_vm1, %v706_v50  ;;  %v705_v54 = vpack.c.bf16 %v554_v51, %v554_v51  ;;  %v557_v55 = vmax.f32 %v515_v52, 0.0  ;;  %v510_v56 = vadd.f32 %v982_v19, %v509_v53 }
 0x1d3   :  { %v802_v57 = vpop.f32.mrf.mxu1 }
 0x1d4   :  { %635 = vst.msk [vmem:[%s1068_s4 + $0x18] sm:$0xf] %vm628_vm1, %v705_v54  ;;  %v708_v58 = vpack.c.bf16 %v557_v55, %v557_v55  ;;  %v556_v59 = vmax.f32 %v510_v56, 0.0  ;;  %v525_v60 = vadd.f32 %v802_v57, %v982_v19 }
 0x1d5   :  { %v519_v61 = vpop.f32.mrf.mxu1 }
 0x1d6   :  { %638 = vst.msk [vmem:[%s1068_s4 + $0x24] sm:$0xf] %vm628_vm1, %v708_v58  ;;  %v707_v62 = vpack.c.bf16 %v556_v59, %v556_v59  ;;  %v559_v63 = vmax.f32 %v525_v60, 0.0  ;;  %v520_v0 = vadd.f32 %v982_v19, %v519_v61 }
 0x1d7   :  { %v805_v1 = vpop.f32.mrf.mxu1 }
 0x1d8   :  { %637 = vst.msk [vmem:[%s1068_s4 + $0x20] sm:$0xf] %vm628_vm1, %v707_v62  ;;  %v710_v2 = vpack.c.bf16 %v559_v63, %v559_v63  ;;  %v558_v3 = vmax.f32 %v520_v0, 0.0  ;;  %v535_v4 = vadd.f32 %v805_v1, %v982_v19 }
 0x1d9   :  { %v529_v5 = vpop.f32.mrf.mxu1 }
 0x1da   :  { %640 = vst.msk [vmem:[%s1068_s4 + $0x2c] sm:$0xf] %vm628_vm1, %v710_v2  ;;  %v709_v6 = vpack.c.bf16 %v558_v3, %v558_v3  ;;  %v561_v7 = vmax.f32 %v535_v4, 0.0  ;;  %v530_v8 = vadd.f32 %v982_v19, %v529_v5 }
 0x1db   :  { %v808_v9 = vpop.f32.mrf.mxu1 }
 0x1dc   :  { %639 = vst.msk [vmem:[%s1068_s4 + $0x28] sm:$0xf] %vm628_vm1, %v709_v6  ;;  %v712_v10 = vpack.c.bf16 %v561_v7, %v561_v7  ;;  %v560_v11 = vmax.f32 %v530_v8, 0.0  ;;  %v545_v12 = vadd.f32 %v808_v9, %v982_v19 }
 0x1dd   :  { %v539_v13 = vpop.f32.mrf.mxu1 }
 0x1de   :  { %642 = vst.msk [vmem:[%s1068_s4 + $0x34] sm:$0xf] %vm628_vm1, %v712_v10  ;;  %v711_v14 = vpack.c.bf16 %v560_v11, %v560_v11  ;;  %v563_v15 = vmax.f32 %v545_v12, 0.0  ;;  %v540_v16 = vadd.f32 %v982_v19, %v539_v13 }
 0x1e0   :  { %641 = vst.msk [vmem:[%s1068_s4 + $0x30] sm:$0xf] %vm628_vm1, %v711_v14  ;;  %v714_v17 = vpack.c.bf16 %v563_v15, %v563_v15  ;;  %v562_v18 = vmax.f32 %v540_v16, 0.0 }
 0x1e2   :  { %644 = vst.msk [vmem:[%s1068_s4 + $0x3c] sm:$0xf] %vm628_vm1, %v714_v17  ;;  %v713_v20 = vpack.c.bf16 %v562_v18, %v562_v18 }
 0x1e4   :  { %643 = vst.msk [vmem:[%s1068_s4 + $0x38] sm:$0xf] %vm628_vm1, %v713_v20 }
 0x1e5   :  { %649 = vsyncpa [#allocation4], 1 }

</bundles_post_ra>
